<compile_context>
chip_gen: v7x
topology: tpu7x:2x2x1
jax: 0.10.0
libtpu: 0.0.40
codegen_flags: <defaults>
</compile_context>

<pallas_src>
import functools

import jax
import jax.numpy as jnp
from jax import lax
from jax.experimental import pallas as pl
from jax.experimental.pallas import tpu as pltpu


def _swl_kernel(pred_ref, labels_ref, *refs, batch, classes, smoothing,
                confidence, gamma, semantic_weight, block_b, use_sim,
                mx_dtype):
    """One batch tile -> per-tile partial loss sum (lane-broadcast to 128)."""
    if use_sim:
        sim_ref, cw_ref, out_ref = refs
    else:
        nemb_ref, nembT_ref, cw_ref, out_ref = refs

    b = pl.program_id(0)

    pred = pred_ref[...].astype(jnp.float32)          # (TB, C)
    labels = labels_ref[...]                          # (TB, 1) int32
    cw = cw_ref[...]                                  # (1, C)  f32

    # ---- log-softmax over classes (per-row; ragged-tile garbage rows stay
    # contained to their own row and are masked below) ------------------------
    m = jnp.max(pred, axis=-1, keepdims=True)
    shifted = pred - m
    exps = jnp.exp(shifted)
    denom = jnp.sum(exps, axis=-1, keepdims=True)
    log_probs = shifted - jnp.log(denom)

    # ---- one-hot from integer labels (iota compare; no argmax, no dense
    # target streamed from HBM) ------------------------------------------------
    col = lax.broadcasted_iota(jnp.int32, (block_b, classes), 1)
    is_true = col == labels                           # (TB, C) bool
    onehot_mx = is_true.astype(mx_dtype)

    # ---- semantic weights: row-gather of the similarity matrix via MXU ------
    if use_sim:
        # sim (C, C) precomputed in the wrapper: single matmul, no (TB, D) temp.
        cur_sim = jnp.dot(onehot_mx, sim_ref[...],
                          preferred_element_type=jnp.float32)        # (TB, C)
    else:
        # Large-C fallback: nemb / nemb.T pre-cast + pre-transposed (resident),
        # so no per-step cast or XLU transpose.
        g = jnp.dot(onehot_mx, nemb_ref[...],
                    preferred_element_type=jnp.float32)              # (TB, D)
        cur_sim = jnp.dot(g.astype(mx_dtype), nembT_ref[...],
                          preferred_element_type=jnp.float32)        # (TB, C)
    sem_w = jnp.where(is_true, 1.0, 1.0 - semantic_weight * cur_sim)

    # ---- label-smoothed target distribution & per-sample class weight -------
    smooth_val = smoothing / (classes - 1) if classes > 1 else 0.0
    true_dist = jnp.where(is_true, confidence, smooth_val)
    onehot_f32 = is_true.astype(jnp.float32)
    sample_w = jnp.sum(onehot_f32 * cw, axis=-1, keepdims=True)      # (TB, 1)

    loss = -true_dist * log_probs * sem_w
    if gamma > 0.0:   # static Python float -> branch traced out when focal off
        # Exact divide on a (TB, 1) vector is essentially free.
        pt = jnp.sum(onehot_f32 * exps, axis=-1, keepdims=True) / denom
        pt = jnp.minimum(pt, 1.0)
        fw = 1.0 - pt
        if float(gamma) == 2.0:
            focal = fw * fw               # skip jnp.power's exp/log pair
        elif float(gamma) == 1.0:
            focal = fw
        else:
            focal = jnp.power(fw, gamma)
        loss = loss * focal

    per_sample = jnp.sum(loss, axis=-1, keepdims=True) * sample_w    # (TB, 1)

    # Mask rows past the true batch size: the wrapper no longer pads, so the
    # last (ragged) tile's out-of-range rows hold garbage -> zero them here.
    row = b * block_b + lax.broadcasted_iota(jnp.int32, (block_b, 1), 0)
    per_sample = jnp.where(row < batch, per_sample, 0.0)

    # Per-tile partial, lane-broadcast into this tile's own (1, 128) output
    # block.  No cross-step carry -> batch axis is "parallel" (v7x megacore).
    out_ref[...] = jnp.full(out_ref.shape, jnp.sum(per_sample),
                            dtype=jnp.float32)


def _round_up(x, m):
    return -(-x // m) * m


def _vmem_capacity_bytes():
    """Physical VMEM per core: 128 MiB on v5e/v6e, 64 MiB on v7x."""
    try:
        info = pltpu.get_tpu_info()
        for attr in ("vmem_capacity_bytes", "vmem_bytes", "vmem_size_bytes"):
            cap = getattr(info, attr, None)
            if cap:
                return int(cap)
    except Exception:
        pass
    return 64 * 1024 * 1024   # most restrictive generation (v7x) as fallback


def semantic_weighted_loss(pred, target, label_embeddings, class_weights=None,
                           *, smoothing=0.1, reduction='mean', gamma=0.0,
                           semantic_weight=0.7, block_b=None,
                           use_bf16_mxu=True):
    if reduction not in ('mean', 'sum'):
        raise ValueError("Reduction must be 'mean' or 'sum'")
    B, C = pred.shape
    D = label_embeddings.shape[1]
    mx_dtype = jnp.bfloat16 if use_bf16_mxu else jnp.float32
    mx_bytes = 2 if use_bf16_mxu else 4

    if class_weights is None:
        class_weights = jnp.ones((C,), dtype=jnp.float32)
    cw = class_weights.reshape(1, C).astype(jnp.float32)

    # ---- grid-invariant preprocessing hoisted out of the kernel -------------
    labels = jnp.argmax(target, axis=-1).astype(jnp.int32).reshape(B, 1)
    emb32 = label_embeddings.astype(jnp.float32)
    nrm = jnp.sqrt(jnp.sum(emb32 * emb32, axis=-1, keepdims=True))
    nemb = emb32 / jnp.maximum(nrm, 1e-12)

    # Small/medium C: precompute the (C, C) similarity matrix once and do a
    # single onehot @ sim per tile.  Very large C: two-matmul reassociation.
    sim_bytes = C * C * mx_bytes
    use_sim = ((C <= 2 * D) or (sim_bytes <= (1 << 20))) and (sim_bytes <= (8 << 20))
    if use_sim:
        sim = jnp.dot(nemb, nemb.T).astype(mx_dtype)          # (C, C) resident
        invariant_ops = (sim, cw)
        invariant_specs = [pl.BlockSpec((C, C), lambda i: (0, 0)),
                           pl.BlockSpec((1, C), lambda i: (0, 0))]
        resident_bytes = sim_bytes + C * 4
    else:
        nemb_mx = nemb.astype(mx_dtype)                        # (C, D)
        nembT_mx = nemb.T.astype(mx_dtype)                     # (D, C)
        invariant_ops = (nemb_mx, nembT_mx, cw)
        invariant_specs = [pl.BlockSpec((C, D), lambda i: (0, 0)),
                           pl.BlockSpec((D, C), lambda i: (0, 0)),
                           pl.BlockSpec((1, C), lambda i: (0, 0))]
        resident_bytes = 2 * C * D * mx_bytes + C * 4
    # TODO(synk): pipeline_mode=pl.Buffered(1) on the grid-invariant operands
    # would drop their second (useless) pipeline buffer and free more VMEM.

    # ---- generation-aware tile / VMEM sizing ---------------------------------
    vmem_cap = _vmem_capacity_bytes()
    vmem_limit = min(vmem_cap // 2, 96 * 1024 * 1024)     # ~64 MiB v5e/v6e, 32 MiB v7x
    if block_b is None:
        budget = vmem_limit // 2                           # headroom for spill/scratch
        per_row = (2 * C * pred.dtype.itemsize             # pred, double-buffered
                   + 2 * 4                                 # labels, double-buffered
                   + 12 * C * 4)                           # f32 temporaries
        if not use_sim:
            per_row += 2 * D * 4                           # (TB, D) 'g' intermediate
        block_b = (budget - 2 * resident_bytes) // max(per_row, 1)
        block_b = max(8, min(2048, block_b))
    block_b = max(8, min(int(block_b), _round_up(B, 8)))
    block_b = (block_b // 8) * 8

    num_tiles = -(-B // block_b)
    # NOTE: no jnp.pad of pred/labels -- the last grid tile is ragged and the
    # kernel masks rows >= B before reducing (saves a full HBM rewrite of pred).

    kernel = functools.partial(
        _swl_kernel,
        batch=B, classes=C,
        smoothing=float(smoothing), confidence=1.0 - float(smoothing),
        gamma=float(gamma), semantic_weight=float(semantic_weight),
        block_b=block_b, use_sim=use_sim, mx_dtype=mx_dtype)

    matmul_flops = 2 * B * C * C if use_sim else 4 * B * C * D
    cost = pl.CostEstimate(
        flops=int(matmul_flops + 16 * B * C),
        transcendentals=int(B * C + 2 * B),
        bytes_accessed=int(pred.size * pred.dtype.itemsize + B * 4
                           + resident_bytes + num_tiles * 128 * 4))

    out = pl.pallas_call(
        kernel,
        out_shape=jax.ShapeDtypeStruct((1, num_tiles * 128), jnp.float32),
        grid=(num_tiles,),
        in_specs=[
            pl.BlockSpec((block_b, C), lambda i: (i, 0)),   # pred   (streamed)
            pl.BlockSpec((block_b, 1), lambda i: (i, 0)),   # labels (streamed)
        ] + invariant_specs,
        out_specs=pl.BlockSpec((1, 128), lambda i: (0, i)), # per-tile partial
        compiler_params=pltpu.CompilerParams(
            dimension_semantics=("parallel",),   # independent tiles -> megacore
            vmem_limit_bytes=int(vmem_limit),
        ),
        cost_estimate=cost,
    )(pred, labels, *invariant_ops)

    partials = out.reshape(num_tiles, 128)[:, 0]
    total = jnp.sum(partials)
    return total / B if reduction == 'mean' else total


def _reference(pred, target, emb, cw, *, smoothing=0.1, gamma=0.0,
               semantic_weight=0.7, reduction='mean'):
    """Pure-JAX reference mirroring the PyTorch forward, for validation."""
    B, C = pred.shape
    log_probs = jax.nn.log_softmax(pred, axis=-1)
    probs = jax.nn.softmax(pred, axis=-1)
    idx = jnp.argmax(target, axis=-1)
    nemb = emb / jnp.maximum(jnp.linalg.norm(emb, axis=1, keepdims=True), 1e-12)
    sim = nemb @ nemb.T
    true_dist = jnp.full((B, C), smoothing / (C - 1), dtype=pred.dtype)
    true_dist = true_dist.at[jnp.arange(B), idx].set(1.0 - smoothing)
    sample_w = cw[idx]
    cur = sim[idx]
    sem_w = 1.0 - semantic_weight * cur
    sem_w = sem_w.at[jnp.arange(B), idx].set(1.0)
    loss = -true_dist * log_probs * sem_w
    if gamma > 0.0:
        pt = probs[jnp.arange(B), idx][:, None]
        loss = loss * jnp.power(1.0 - pt, gamma)
    loss = jnp.sum(loss, axis=-1) * sample_w
    total = jnp.sum(loss)
    return total / B if reduction == 'mean' else total


if __name__ == "__main__":
    key = jax.random.PRNGKey(0)
    B, C, D = 60, 16, 32      # block_b=16 -> grid of 4, last tile ragged (12 rows)
    k1, k2, k3, k4 = jax.random.split(key, 4)

    pred = jax.random.normal(k1, (B, C), dtype=jnp.float32)
    label_ids = jax.random.randint(k2, (B,), 0, C)
    target = jax.nn.one_hot(label_ids, C, dtype=jnp.float32)
    label_embeddings = jax.random.normal(k3, (C, D), dtype=jnp.float32)
    class_weights = jax.random.uniform(k4, (C,), dtype=jnp.float32,
                                       minval=0.5, maxval=1.5)

    ref = _reference(pred, target, label_embeddings, class_weights)

    # Default path: bf16 MXU gather of the (f32-accumulated) similarity matrix.
    # sim only feeds a 0..1 weighting term -> ~1e-3-level perturbation expected.
    loss_bf16 = semantic_weighted_loss(pred, target, label_embeddings,
                                       class_weights, block_b=16)
    loss_bf16 = jax.block_until_ready(loss_bf16)
    assert jnp.allclose(loss_bf16, ref, rtol=1e-2, atol=1e-2), (loss_bf16, ref)

    # Exact f32 MXU path (bit-faithful to the reference semantics).
    loss_f32 = semantic_weighted_loss(pred, target, label_embeddings,
                                      class_weights, block_b=16,
                                      use_bf16_mxu=False)
    loss_f32 = jax.block_until_ready(loss_f32)
    assert jnp.allclose(loss_f32, ref, rtol=1e-5, atol=1e-5), (loss_f32, ref)

    # Focal path: gamma=2 special-cased (fw*fw), exact divide for pt.
    loss_focal = semantic_weighted_loss(pred, target, label_embeddings,
                                        class_weights, gamma=2.0,
                                        reduction='sum', block_b=16,
                                        use_bf16_mxu=False)
    loss_focal = jax.block_until_ready(loss_focal)
    ref_focal = _reference(pred, target, label_embeddings, class_weights,
                           gamma=2.0, reduction='sum')
    assert jnp.allclose(loss_focal, ref_focal, rtol=1e-4, atol=1e-4), (
        loss_focal, ref_focal)

    # Exercise the generation-aware auto block_b sizing once (single big tile).
    loss_auto = semantic_weighted_loss(pred, target, label_embeddings,
                                       class_weights, use_bf16_mxu=False)
    loss_auto = jax.block_until_ready(loss_auto)
    assert jnp.allclose(loss_auto, ref, rtol=1e-5, atol=1e-5), (loss_auto, ref)

    print("KERNEL_OK")
</pallas_src>

<mosaic_0001>
module attributes {stable_mosaic.version = 11 : i64} {
  func.func @_swl_kernel(%arg0: i32, %arg1: memref<16x16xf32, #tpu.memory_space<vmem>>, %arg2: memref<16x1xi32, #tpu.memory_space<vmem>>, %arg3: memref<16x16xbf16, #tpu.memory_space<vmem>>, %arg4: memref<1x16xf32, #tpu.memory_space<vmem>>, %arg5: memref<1x128xf32, #tpu.memory_space<vmem>>) attributes {dimension_semantics = [#tpu.dimension_semantics<parallel>], iteration_bounds = array<i64: 4>, scalar_prefetch = 0 : i64, scratch_operands = 0 : i64, tpu.core_type = #tpu.core_type<tc>, window_params = [{transform_indices = @transform_0, window_bounds = array<i64: 16, 16>}, {transform_indices = @transform_1, window_bounds = array<i64: 16, 1>}, {pipeline_mode = #tpu.pipeline_mode<synchronous>, transform_indices = @transform_2, window_bounds = array<i64: 16, 16>}, {pipeline_mode = #tpu.pipeline_mode<synchronous>, transform_indices = @transform_3, window_bounds = array<i64: 1, 16>}, {transform_indices = @transform_4, window_bounds = array<i64: 1, 128>}]} {
    %c0 = arith.constant 0 : index
    %c0_0 = arith.constant 0 : index
    %0 = vector.load %arg1[%c0, %c0_0] : memref<16x16xf32, #tpu.memory_space<vmem>>, vector<16x16xf32>
    %c0_1 = arith.constant 0 : index
    %c0_2 = arith.constant 0 : index
    %1 = vector.load %arg2[%c0_1, %c0_2] : memref<16x1xi32, #tpu.memory_space<vmem>>, vector<16x1xi32>
    %c0_3 = arith.constant 0 : index
    %c0_4 = arith.constant 0 : index
    %2 = vector.load %arg4[%c0_3, %c0_4] : memref<1x16xf32, #tpu.memory_space<vmem>>, vector<1x16xf32>
    %cst = arith.constant dense<0xFF800000> : vector<16xf32>
    %3 = vector.multi_reduction <maximumf>, %0, %cst [1] : vector<16x16xf32> to vector<16xf32>
    %4 = vector.shape_cast %3 : vector<16xf32> to vector<16x1xf32>
    %5 = vector.broadcast %4 : vector<16x1xf32> to vector<16x16xf32>
    %6 = arith.subf %0, %5 : vector<16x16xf32>
    %7 = math.exp %6 : vector<16x16xf32>
    %cst_5 = arith.constant dense<0.000000e+00> : vector<16xf32>
    %8 = vector.multi_reduction <add>, %7, %cst_5 [1] : vector<16x16xf32> to vector<16xf32>
    %9 = vector.shape_cast %8 : vector<16xf32> to vector<16x1xf32>
    %10 = math.log %9 : vector<16x1xf32>
    %11 = vector.broadcast %10 : vector<16x1xf32> to vector<16x16xf32>
    %12 = arith.subf %6, %11 : vector<16x16xf32>
    %13 = tpu.iota {dimensions = array<i32: 1>} : vector<16x16xi32>
    %14 = vector.broadcast %1 : vector<16x1xi32> to vector<16x16xi32>
    %15 = arith.cmpi eq, %13, %14 : vector<16x16xi32>
    %16 = arith.extui %15 : vector<16x16xi1> to vector<16x16xi32>
    %17 = arith.sitofp %16 : vector<16x16xi32> to vector<16x16xf32>
    %18 = arith.truncf %17 : vector<16x16xf32> to vector<16x16xbf16>
    %c0_6 = arith.constant 0 : index
    %c0_7 = arith.constant 0 : index
    %19 = vector.load %arg3[%c0_6, %c0_7] : memref<16x16xbf16, #tpu.memory_space<vmem>>, vector<16x16xbf16>
    %cst_8 = arith.constant dense<0.000000e+00> : vector<16x16xf32>
    %20 = tpu.matmul %18, %19, %cst_8 {dimension_numbers = #tpu.dot_dimension_numbers<[1], [0], [0], [1], [0, 0, 1, 1], [], []>} : vector<16x16xbf16>, vector<16x16xbf16>, vector<16x16xf32> -> vector<16x16xf32>
    %cst_9 = arith.constant 0.699999988 : f32
    %21 = vector.broadcast %cst_9 : f32 to vector<16x16xf32>
    %22 = arith.mulf %21, %20 : vector<16x16xf32>
    %cst_10 = arith.constant 1.000000e+00 : f32
    %23 = vector.broadcast %cst_10 : f32 to vector<16x16xf32>
    %24 = arith.subf %23, %22 : vector<16x16xf32>
    %cst_11 = arith.constant 1.000000e+00 : f32
    %25 = vector.broadcast %cst_11 : f32 to vector<16x16xf32>
    %26 = arith.select %15, %25, %24 : vector<16x16xi1>, vector<16x16xf32>
    %cst_12 = arith.constant 0.899999976 : f32
    %cst_13 = arith.constant 0.00666666683 : f32
    %27 = vector.broadcast %cst_12 : f32 to vector<16x16xf32>
    %28 = vector.broadcast %cst_13 : f32 to vector<16x16xf32>
    %29 = arith.select %15, %27, %28 : vector<16x16xi1>, vector<16x16xf32>
    %30 = arith.extui %15 : vector<16x16xi1> to vector<16x16xi32>
    %31 = arith.sitofp %30 : vector<16x16xi32> to vector<16x16xf32>
    %32 = vector.broadcast %2 : vector<1x16xf32> to vector<16x16xf32>
    %33 = arith.mulf %31, %32 : vector<16x16xf32>
    %cst_14 = arith.constant dense<0.000000e+00> : vector<16xf32>
    %34 = vector.multi_reduction <add>, %33, %cst_14 [1] : vector<16x16xf32> to vector<16xf32>
    %35 = vector.shape_cast %34 : vector<16xf32> to vector<16x1xf32>
    %cst_15 = arith.constant 0.000000e+00 : f32
    %36 = vector.broadcast %cst_15 : f32 to vector<16x16xf32>
    %37 = arith.subf %36, %29 : vector<16x16xf32>
    %38 = arith.mulf %37, %12 : vector<16x16xf32>
    %39 = arith.mulf %38, %26 : vector<16x16xf32>
    %cst_16 = arith.constant dense<0.000000e+00> : vector<16xf32>
    %40 = vector.multi_reduction <add>, %39, %cst_16 [1] : vector<16x16xf32> to vector<16xf32>
    %41 = vector.shape_cast %40 : vector<16xf32> to vector<16x1xf32>
    %42 = arith.mulf %41, %35 : vector<16x1xf32>
    %c16_i32 = arith.constant 16 : i32
    %43 = arith.muli %arg0, %c16_i32 : i32
    %44 = tpu.iota {dimensions = array<i32: 0>} : vector<16x1xi32>
    %45 = vector.broadcast %43 : i32 to vector<16x1xi32>
    %46 = arith.addi %45, %44 : vector<16x1xi32>
    %c60_i32 = arith.constant 60 : i32
    %47 = vector.broadcast %c60_i32 : i32 to vector<16x1xi32>
    %48 = arith.cmpi slt, %46, %47 : vector<16x1xi32>
    %cst_17 = arith.constant 0.000000e+00 : f32
    %49 = vector.broadcast %cst_17 : f32 to vector<16x1xf32>
    %50 = arith.select %48, %42, %49 : vector<16x1xi1>, vector<16x1xf32>
    %51 = vector.shape_cast %50 : vector<16x1xf32> to vector<1x16x1xf32>
    %cst_18 = arith.constant dense<0.000000e+00> : vector<1xf32>
    %52 = vector.multi_reduction <add>, %51, %cst_18 [1, 2] : vector<1x16x1xf32> to vector<1xf32>
    %53 = vector.shape_cast %52 : vector<1xf32> to vector<1x1x1xf32>
    %54 = vector.extract %53[0, 0, 0] : f32 from vector<1x1x1xf32>
    %55 = vector.broadcast %54 : f32 to vector<1x128xf32>
    %c0_19 = arith.constant 0 : index
    %c0_20 = arith.constant 0 : index
    %56 = vector.load %arg5[%c0_19, %c0_20] : memref<1x128xf32, #tpu.memory_space<vmem>>, vector<1x128xf32>
    tpu.vector_store %arg5[%c0_19, %c0_20], %55 {strides = array<i32>} : memref<1x128xf32, #tpu.memory_space<vmem>>, vector<1x128xf32>,
    return
  }
  func.func @transform_0(%arg0: i32) -> (i32, i32) {
    %c0_i32 = arith.constant 0 : i32
    %c0_i32_0 = arith.constant 0 : i32
    return %arg0, %c0_i32 : i32, i32
  }
  func.func @transform_1(%arg0: i32) -> (i32, i32) {
    %c0_i32 = arith.constant 0 : i32
    %c0_i32_0 = arith.constant 0 : i32
    return %arg0, %c0_i32 : i32, i32
  }
  func.func @transform_2(%arg0: i32) -> (i32, i32) {
    %c0_i32 = arith.constant 0 : i32
    %c0_i32_0 = arith.constant 0 : i32
    %c0_i32_1 = arith.constant 0 : i32
    return %c0_i32, %c0_i32_0 : i32, i32
  }
  func.func @transform_3(%arg0: i32) -> (i32, i32) {
    %c0_i32 = arith.constant 0 : i32
    %c0_i32_0 = arith.constant 0 : i32
    %c0_i32_1 = arith.constant 0 : i32
    return %c0_i32, %c0_i32_0 : i32, i32
  }
  func.func @transform_4(%arg0: i32) -> (i32, i32) {
    %c0_i32 = arith.constant 0 : i32
    %c0_i32_0 = arith.constant 0 : i32
    return %c0_i32, %arg0 : i32, i32
  }
}

</mosaic_0001>

<bundles_post_ra>
// kernel: tpu_custom_call.1
= control target key start
LH: loop header
LB: loop body
LE: loop exit
PB: predicated region body
PF: predicated region fallthrough
CT: control target
= control target key end

     0   :  { %9 = vsyncpa [#allocation3], 0  ;;  %s762_s0 = inlined_call_operand.vmem [shape: f32[60,16], index: 0, kind: input, shape index: {}]   ;;  %s763_s1 = inlined_call_operand.vmem [shape: s32[60,1], index: 1, kind: input, shape index: {}]   ;;  %s764_s2 = inlined_call_operand.vmem [shape: bf16[16,16], index: 2, kind: input, shape index: {}]   ;;  %s765_s3 = inlined_call_operand.vmem [shape: f32[1,16], index: 3, kind: input, shape index: {}]   ;;  %s766_s4 = inlined_call_operand.hbm [shape: f32[1,512], index: 4, kind: output, shape index: {}]  }
   0x1   :  { %11 = vsyncpa [#allocation3 + $0x1], 0  ;;  %s633_s15 = smov 0   ;;  %s635_s16 = smov 0  }
   0x2   :  { %s637_s17 = smov 0   ;;  %s639_s18 = smov 0  }
   0x3 LB: > { %s654_s19 = sadd.s32 4294967295, %s601_s18   ;;  %s459_s20 = sadd.s32 4294967294, %s601_s18   ;;  %s601_s18 = sphi %s639_s18, %s772_s18   ;;  %s597_s17 = sphi %s637_s17, %s771_s17   ;;  %s593_s16 = sphi %s635_s16, %s770_s16   ;;  %s589_s15 = sphi %s633_s15, %s769_s15  }
   0x4   : > { %s658_s21 = sadd.s32 1, %s601_s18   ;;  %s118_s22 = sadd.s32 1, %s597_s17 }
   0x5   : > { %s115_s23 = ssub.s32 %s601_s18, %s658_s21  ;;  %p128_p0 = scmp.ne.s32.totalorder %s597_s17, %s593_s16 }
   0x6   : > { %p116_p1 = scmp.eq.s32.totalorder %s115_s23, 0  ;;  %p129_p2 = scmp.eq.s32.totalorder %s654_s19, 3 }
   0x7   : > { %p134_p3 = scmp.ne.s32.totalorder %s593_s16, %s589_s15  ;;  %p135_p4 = scmp.eq.s32.totalorder %s459_s20, 3 }
   0x8   : > { %s669_s24 = scalar_select %p116_p1, %s597_s17, %s118_s22  }
   0x9   : > { %p671_p5 = por %p129_p2, %p128_p0  ;;  %p675_p6 = por %p135_p4, %p134_p3 }
   0xa   : > { %p462_p7 = scmp.ge.s32.totalorder %s601_s18, 1  ;;  %p177_p8 = scmp.lt.s32.totalorder %s601_s18, 5 }
   0xc   : > { %p178_p9 = pnand %p462_p7, %p177_p8 }
   0xd   : > { %s463_s27 = sshll.u32 (!%p178_p9), %s654_s19, 1  ;;  %v603_v0 = vmov (!%p178_p9), 0   ;;  %v604_v1 = vmov (!%p178_p9), 0.0   ;;  %vm225_vm0 = vcmask (!%p178_p9), 130048   ;;  %v530_v8 = vld [vmem:[%s764_s2] sm:$0xff] (!%p178_p9)   ;;  %vm605_vm1 = vmmov (!%p178_p9), 0  }
   0xe   : > { %181 = sbr.rel (%p178_p9) target bundleno = 752 (0x2f0), region = 36  ;;  %529 = vset.pattern.permute.xlu0 (!%p178_p9), %v603_v0  ;;  %p208_p10 = scmp.lt.s32.totalorder (!%p178_p9), %s463_s27, 7  ;;  %478 = vmatprep.subr.bf16.mxu0 (!%p178_p9), %v604_v1  ;;  %v250_v9 = vlaneseq (!%p178_p9)  ;;  %v471_v24 = vld [vmem:[%s765_s3] ss:$0 sm:$0xff] (!%p178_p9)  ;;  %v606_v37 = vmov (!%p178_p9), 0.006666667  }
   0xf   : > { %479 = vmatpush3.bf16.msra.mxu0 (!%p178_p9), %v530_v8  ;;  %480 = vmatprep.mubr.msk.bf16.mxu0 (!%p178_p9), %vm605_vm1, %v604_v1  ;;  %s472_s13 = sshll.u32 (!%p178_p9), %s654_s19, 4  ;;  %vm364_vm6 = vcmask (!%p178_p9), 7168   ;;  %s205_s14 = sand.u32 (!%p178_p9), 1, %s593_s16  }
  0x10   : > { %v251_v10 = vand.u32 (!%p178_p9), 127, %v250_v9  ;;  %v355_v61 = vshrl.u32 (!%p178_p9), %v250_v9, 7  ;;  %v357_v62 = vstv (!%p178_p9), %s472_s13  ;;  %s206_s20 = scalar_lea.vmem (!%p178_p9), [#allocation2], %s205_s14  ;;  %s722_s29 = scalar_lea.hbm (!%p178_p9), %s766_s4, %s472_s13 }
  0x11   : > { %s392_s22 = sshll.u32 (!%p178_p9), %s206_s20, 4  ;;  %s380_s30 = scalar_lea.sflag (!%p178_p9), [#allocation3], %s205_s14  ;;  %s715_s22 = int_to_ptr.vmem [resolvable:$true] %s392_s22 }
  0x12   : > { %v356_v0 = vadd.s32 (!%p178_p9), 8, %v355_v61  ;;  %s607_s6 = smov (!%p178_p9), [#allocation2]  }
  0x13   : > { %s543_s7 = sshll.u32 (!%p178_p9), %s607_s6, 4  ;;  %s544_s7 = int_to_ptr.vmem [resolvable:$false] %s543_s7 }
  0x14   : > { %p546_p0 = scmp.lt.s32.totalorder (!%p178_p9), %s715_s22, %s544_s7 }
  0x15   : > { %s774_s27 = smov (!%p208_p10, %s463_s27), 7 }
  0x16   : > { %s464_s28 = sshll.u32 %s774_s27, 3 }
  0x17   : > { %s217_s5 = scalar_lea.vmem %s763_s1, %s464_s28  ;;  %s211_s8 = scalar_lea.vmem %s762_s0, %s464_s28 }
  0x18   : > { %v222_v2 = vld [vmem:[%s217_s5] sm:$0xff]  ;;  %v221_v5 = vld [vmem:[%s211_s8 + $0x8] sm:$0xff] }
  0x19   : > { %v220_v3 = vld [vmem:[%s211_s8] sm:$0xff]  ;;  %253 = vperm.xlu0 %529, %v222_v2   ;;  %v223_v6 = vld [vmem:[%s217_s5 + $0x8] sm:$0xff]  ;;  %v229_v7 = vsel %vm225_vm0, %v221_v5, -inf  ;;  %s539_s5 = scalar_lea.vmem %s715_s22, 16  ;;  %s545_s8 = scalar_lea.vmem %s544_s7, 32 }
  0x1a   : > { %v226_v4 = vsel %vm225_vm0, %v220_v3, -inf  ;;  %p540_p11 = scmp.ne.s32.totalorder %s715_s22, %s539_s5  ;;  %p547_p1 = scmp.lt.s32.totalorder %s545_s8, %s539_s5 }
  0x1b   : > { %227 = vmax.xlane.f32.xlu1 %v226_v4 }
  0x1c   : > { %p541_p12 = pnand %p540_p11, %p671_p5  ;;  %p548_p2 = por %p547_p1, %p546_p0 }
  0x1d   : > { %256 = vperm.xlu0 %529, %v223_v6  }
  0x1e   : > { %p542_p13 = pneg %p541_p12 }
  0x1f   : > { %230 = vmax.xlane.f32.xlu1 %v229_v7 }
  0x20   : > { %p549_p3 = pnand %p548_p2, %p542_p13 }
  0x98   : > { %v254_v11 = vpop.permute.xlu0 %253 }
  0x99   : > { %vm258_vm2 = vcmp.eq.s32.totalorder %v251_v10, %v254_v11 }
  0x9a   : > { %v467_v13 = vsel %vm258_vm2, 1.0, %v604_v1  ;;  %v323_v38 = vsel %vm258_vm2, 0.9, %v606_v37 }
  0x9b   : > { %v331_v27 = vmul.f32 %v471_v24, %v467_v13  ;;  %v339_v44 = vsub.f32 0.0, %v323_v38 }
  0x9c   : > { %v257_v12 = vpop.permute.xlu0 %256 }
  0x9d   : > { %vm259_vm3 = vcmp.eq.s32.totalorder %v251_v10, %v257_v12  ;;  %v333_v28 = vsel %vm225_vm0, %v331_v27, 0.0 }
  0x9e   : > { %v468_v14 = vsel %vm259_vm3, 1.0, %v604_v1  ;;  %v324_v41 = vsel %vm259_vm3, 0.9, %v606_v37  ;;  %v358_v1 = vadd.s32 %v357_v62, %v355_v61 }
  0x9f   : > { %v264_v15 = vpack.c.bf16 %v468_v14, %v467_v13  ;;  %v332_v29 = vmul.f32 %v471_v24, %v468_v14  ;;  %v340_v50 = vsub.f32 0.0, %v324_v41 }
  0xa0   : > { %vm360_vm4 = vcmp.lt.s32.totalorder %v358_v1, 60 }
  0xa1   : > { %481 = vmatmul.mubr.msk.bf16.vlgmr.msra.gmra.mrb[0].mxu0 %vm225_vm0, %v264_v15  ;;  %v336_v30 = vsel %vm225_vm0, %v332_v29, 0.0 }
  0xa8   : > { %v228_v16 = vpop.xlane.xlu1 %227 }
  0xa9   : > { %v232_v17 = vsub.f32 %v220_v3, %v228_v16  ;;  %v359_v3 = vadd.s32 %v357_v62, %v356_v0 }
  0xab   : > { %v234_v18 = vmul.f32 1.442695, %v232_v17  ;;  %vm361_vm5 = vcmp.lt.s32.totalorder %v359_v3, 60 }
  0xac   : > { %v231_v19 = vpop.xlane.xlu1 %230 }
  0xad   : > { %531 = vpow2.f32 %v234_v18  ;;  %v233_v20 = vsub.f32 %v221_v5, %v231_v19 }
  0xaf   : > { %v236_v21 = vmul.f32 1.442695, %v233_v20 }
  0xb1   : > { %533 = vpow2.f32 %v236_v21 }
  0xb7   : > { %v532_v22 = vpop.eup %531 }
  0xb8   : > { %v238_v23 = vsel %vm225_vm0, %v532_v22, 0.0 }
  0xb9   : > { %239 = vadd.xlane.f32.xlu0 %v238_v23 }
  0xbb   : > { %v534_v25 = vpop.eup %533 }
  0xbc   : > { %v241_v26 = vsel %vm225_vm0, %v534_v25, 0.0 }
  0xbd   : > { %242 = vadd.xlane.f32.xlu1 %v241_v26 }
  0xc1   : > { %334 = vadd.xlane.f32.xlu1 %v333_v28 }
  0xc5   : > { %337 = vadd.xlane.f32.xlu1 %v336_v30 }
 0x146   : > { %v240_v31 = vpop.xlane.xlu0 %239 }
 0x147   : > { %535 = vlog2.f32 %v240_v31 }
 0x14a   : > { %v243_v32 = vpop.xlane.xlu1 %242 }
 0x14b   : > { %537 = vlog2.f32 %v243_v32 }
 0x14e   : > { %v335_v60 = vpop.xlane.xlu1 %334 }
 0x151   : > { %v536_v33 = vpop.eup %535 }
 0x152   : > { %v245_v35 = vmul.f32 0.6931472, %v536_v33  ;;  %v338_v63 = vpop.xlane.xlu1 %337 }
 0x154   : > { %v248_v39 = vsub.f32 %v232_v17, %v245_v35 }
 0x155   : > { %v538_v34 = vpop.eup %537 }
 0x156   : > { %v247_v36 = vmul.f32 0.6931472, %v538_v34  ;;  %v341_v51 = vmul.f32 %v339_v44, %v248_v39 }
 0x158   : > { %v249_v45 = vsub.f32 %v233_v20, %v247_v36 }
 0x15a   : > { %v342_v55 = vmul.f32 %v340_v50, %v249_v45 }
 0x174   : > { %v310_v40 = vpop.f32.mrb[0].mxu0 }
 0x175   : > { %v317_v42 = vmul.f32 0.7, %v310_v40  ;;  %v482_v43 = vpop.f32.mrb[1].mxu0 }
 0x176   : > { %v313_v46 = vpop.f32.mrb[2].mxu0 }
 0x177   : > { %v319_v47 = vsub.f32 1.0, %v317_v42  ;;  %v318_v48 = vmul.f32 0.7, %v313_v46  ;;  %v483_v49 = vpop.f32.mrb[3].mxu0 }
 0x179   : > { %v321_v52 = vsel %vm258_vm2, 1.0, %v319_v47  ;;  %v320_v53 = vsub.f32 1.0, %v318_v48 }
 0x17a   : > { %v343_v54 = vmul.f32 %v341_v51, %v321_v52 }
 0x17b   : > { %v322_v56 = vsel %vm259_vm3, 1.0, %v320_v53 }
 0x17c   : > { %v345_v57 = vsel %vm225_vm0, %v343_v54, 0.0  ;;  %v344_v58 = vmul.f32 %v342_v55, %v322_v56 }
 0x17d   : > { %346 = vadd.xlane.f32.xlu1 %v345_v57 }
 0x17e   : > { %v348_v59 = vsel %vm225_vm0, %v344_v58, 0.0 }
 0x181   : > { %349 = vadd.xlane.f32.xlu1 %v348_v59 }
 0x20a   : > { %v347_v2 = vpop.xlane.xlu1 %346 }
 0x20b   : > { %v351_v4 = vmul.f32 %v347_v2, %v335_v60 }
 0x20d   : > { %v362_v6 = vsel %vm360_vm4, %v351_v4, 0.0 }
 0x20e   : > { %v350_v5 = vpop.xlane.xlu1 %349  ;;  %v365_v10 = vsel %vm364_vm6, %v362_v6, 0.0 }
 0x20f   : > { %v352_v7 = vmul.f32 %v350_v5, %v338_v63 }
 0x211   : > { %v363_v8 = vsel %vm361_vm5, %v352_v7, 0.0 }
 0x212   : > { %v366_v11 = vsel %vm364_vm6, %v363_v8, 0.0 }
 0x213   : > { %v367_v9 = vadd.f32 %v366_v11, %v365_v10 }
 0x215   : > { %368 = vadd.xlane.f32.xlu1 %v367_v9 }
 0x2a2   : > { %v369_v12 = vpop.xlane.xlu1 %368 }
 0x2a3   : > { %v370_v13 = vrot.slane %v369_v12, 4 }
 0x2a5   : > { %v371_v14 = vadd.f32 %v370_v13, %v369_v12 }
 0x2a7   : > { %v372_v15 = vrot.slane %v371_v14, 2 }
 0x2a9   : > { %v373_v16 = vadd.f32 %v372_v15, %v371_v14 }
 0x2ab   : > { %v374_v17 = vrot.slane %v373_v16, 1 }
 0x2ad   : > { %v375_v18 = vadd.f32 %v374_v17, %v373_v16 }
 0x2af   : > { %484 = vpush %v375_v18 }
 0x2e0   : > { %s485_s23 = spop %484 }
 0x2e1   : > { %v377_v19 = vstv %s485_s23 }
 0x2e2   : > { %378 = vst [vmem:[%s206_s20] sm:$0x1] %v377_v19 }
 0x2e3   : > { %552 = shalt.err (!%p549_p3)
}
 0x2e4   : > { %s553_s19 = scalar_lea.hbm %s722_s29, 16  ;;  %s557_s11 = scalar_lea.hbm %s766_s4, 64 }
 0x2e5   : > { %p554_p4 = scmp.ne.s32.totalorder %s722_s29, %s553_s19  ;;  %p558_p9 = scmp.lt.u32.totalorder %s722_s29, %s766_s4 }
 0x2e6   : > { %p559_p10 = scmp.lt.u32.totalorder %s557_s11, %s553_s19  ;;  %p561_p12 = scmp.lt.u32.totalorder %s553_s19, %s722_s29 }
 0x2e7   : > { %p555_p7 = pnand %p554_p4, %p671_p5 }
 0x2e8   : > { %p560_p11 = por %p559_p10, %p558_p9 }
 0x2e9   : > { %p556_p8 = pneg %p555_p7 }
 0x2ea   : > { %p562_p13 = por %p561_p12, %p560_p11 }
 0x2ec   : > { %p563_p0 = pnand %p562_p13, %p556_p8 }
 0x2ee   : > { %566 = shalt.err (!%p563_p0)
}
 0x2ef   : > { %486 = dma.vmem_to_hbm [thread:$0]  (%p671_p5), %s715_s22, 16, %s722_s29, %s380_s30  }
 0x2f0 PF: > { %p492_p1 = scmp.ge.s32.totalorder %s601_s18, 2  ;;  %s404_s14 = sand.u32 1, %s589_s15  }
 0x2f1   : > { %s405_s20 = scalar_lea.sflag [#allocation3], %s404_s14 }
 0x2f2   : > { %p489_p2 = pnand %p492_p1, %p675_p6 }
 0x2f4   : > { %584 = dma.done.wait (!%p489_p2), %s405_s20, 16  }
 0x2f5   : > { %586 = vsyncadd (!%p489_p2), %s405_s20, 4294967280  ;;  %p14_p3 = scmp.ge.s32.totalorder %s658_s21, 6   ;;  %s769_s15 = smov %s593_s16 }
 0x2f6   : > { %s770_s16 = smov %s597_s17  ;;  %s771_s17 = smov %s669_s24 }
 0x2f7   : > { %s772_s18 = smov %s658_s21  ;;  %16 = sbr.rel (!%p14_p3) target bundleno = 3 (0x3), region = 74 }
 0x2fe   :  { %409 = vsyncpa [#allocation3], 1 }
 0x2ff   :  { %411 = vsyncpa [#allocation3 + $0x1], 1 }

</bundles_post_ra>
